<compile_context>
chip_gen: v7x
topology: tpu7x:2x2x1
jax: 0.10.0
libtpu: 0.0.40
codegen_flags: <defaults>
</compile_context>

<pallas_src>
import math

import jax
import jax.numpy as jnp
from jax.experimental import pallas as pl
from jax.experimental.pallas import tpu as pltpu

EPS = 1e-8


def _normalize_kernel(x_ref, mean_ref, inv_ref, o_ref):
    # x_ref/o_ref: (TB, TF); mean_ref/inv_ref: (1, TF) f32, broadcast over sublanes.
    x = x_ref[...].astype(jnp.float32)
    o_ref[...] = ((x - mean_ref[...]) * inv_ref[...]).astype(o_ref.dtype)


def _round_up(a: int, b: int) -> int:
    return ((a + b - 1) // b) * b


def unit_gaussian_encode(x, mean, std, *, tile_f=None, tile_b=None):
    """Pallas TPU implementation of UnitGaussianNormalizer.encode.

    x: (B, ...) array;  mean, std: (F,) with F = prod(x.shape[1:]).
    """
    s = x.shape
    B = s[0]
    F = math.prod(s[1:])
    assert mean.shape == (F,) and std.shape == (F,)

    dtype = x.dtype
    itemsize = jnp.dtype(dtype).itemsize
    sublane = max(8, 32 // itemsize)          # 8 for f32, 16 for bf16, 32 for int8/fp8

    # ---- generation-aware VMEM budget & default tile sizes -------------------
    try:
        vmem_cap = pltpu.get_tpu_info().vmem_capacity_bytes
    except Exception:
        vmem_cap = 64 << 20                   # conservative (v7x) fallback
    if vmem_cap > (64 << 20):                 # v5e / v6e: 128 MiB physical VMEM
        vmem_budget = 96 << 20
        target_block = 8 << 20
    else:                                     # v7x: 64 MiB per TensorCore
        vmem_budget = 40 << 20
        target_block = 4 << 20

    if tile_f is None:
        tile_f = max(128, _round_up(target_block // (256 * itemsize), 128))
    if tile_b is None:
        tile_b = 256
    assert tile_f % 128 == 0 and tile_b % sublane == 0

    x2 = x.reshape(B, F)
    # f32 stats; precompute reciprocal so the kernel multiplies instead of divides.
    mean32 = mean.astype(jnp.float32).reshape(1, F)
    inv32 = (1.0 / (std.astype(jnp.float32) + EPS)).reshape(1, F)

    # ---- tile selection (no padding: partial edge blocks are masked) ---------
    f_128 = _round_up(F, 128)
    TF = min(tile_f, f_128)                   # lane tile, multiple of 128
    TB = min(tile_b, _round_up(B, sublane))   # sublane-aligned batch tile
    # Small-batch compensation: widen the lane tile so each block still moves a
    # meaningful amount of data (amortizes fixed per-grid-step overhead).
    while TB * TF * itemsize < target_block and TF < f_128:
        TF = min(2 * TF, f_128)
    nB = pl.cdiv(B, TB)
    nF = pl.cdiv(F, TF)
    # Ensure >= 2 grid steps along a parallel axis when the whole array would
    # otherwise fit one block (pipelining + v7x 2-TensorCore grid sharding).
    if nB == 1 and nF == 1 and f_128 >= 256:
        TF = _round_up(pl.cdiv(f_128, 2), 128)
        nF = pl.cdiv(F, TF)

    # ---- VMEM limit sized to the actual double-buffered working set ----------
    block_bytes = TB * TF * itemsize
    stats_bytes = TF * 4                      # f32 stats tiles
    vmem_limit = 2 * 2 * block_bytes + 2 * 2 * stats_bytes + (2 << 20)
    vmem_limit = int(min(max(vmem_limit, 16 << 20), vmem_budget))

    # Grid: feature axis OUTER, batch axis INNER -> stats block index is
    # unchanged across consecutive steps, so mean/inv tiles are not re-fetched.
    grid = (nF, nB)

    out = pl.pallas_call(
        _normalize_kernel,
        out_shape=jax.ShapeDtypeStruct((B, F), dtype),
        grid_spec=pltpu.PrefetchScalarGridSpec(
            num_scalar_prefetch=0,
            grid=grid,
            in_specs=[
                pl.BlockSpec((TB, TF), lambda j, i: (i, j)),   # x
                pl.BlockSpec((1, TF), lambda j, i: (0, j)),    # mean (f32)
                pl.BlockSpec((1, TF), lambda j, i: (0, j)),    # 1/(std+eps) (f32)
            ],
            out_specs=pl.BlockSpec((TB, TF), lambda j, i: (i, j)),
        ),
        compiler_params=pltpu.CompilerParams(
            dimension_semantics=("parallel", "parallel"),
            vmem_limit_bytes=vmem_limit,
        ),
    )(x2, mean32, inv32)

    return out.reshape(s)


if __name__ == "__main__":
    key = jax.random.PRNGKey(0)
    k_data, k_x = jax.random.split(key)

    B, C, H, W = 2, 4, 16, 16

    # Deterministic "statistics" construction, mimicking __init__(x=data):
    # mean = data.mean(0).view(-1), std = data.std(0).view(-1)  (torch std is unbiased)
    data = jax.random.normal(k_data, (8, C, H, W), dtype=jnp.float32) * 2.0 + 0.5
    mean = jnp.mean(data, axis=0).reshape(-1)
    std = jnp.std(data, axis=0, ddof=1).reshape(-1)

    x = jax.random.normal(k_x, (B, C, H, W), dtype=jnp.float32)

    y = unit_gaussian_encode(x, mean, std)
    y = jax.block_until_ready(y)

    # sanity check against pure-JAX reference (exact module semantics: divide)
    ref = ((x.reshape(B, -1) - mean) / (std + EPS)).reshape(x.shape)
    assert jnp.allclose(y, ref, atol=1e-5, rtol=1e-5), float(jnp.max(jnp.abs(y - ref)))

    print("KERNEL_OK")
</pallas_src>

<mosaic_0001>
module attributes {stable_mosaic.version = 11 : i64} {
  func.func @_normalize_kernel(%arg0: i32, %arg1: i32, %arg2: memref<8x512xf32, #tpu.memory_space<vmem>>, %arg3: memref<1x512xf32, #tpu.memory_space<vmem>>, %arg4: memref<1x512xf32, #tpu.memory_space<vmem>>, %arg5: memref<8x512xf32, #tpu.memory_space<vmem>>) attributes {dimension_semantics = [#tpu.dimension_semantics<parallel>, #tpu.dimension_semantics<parallel>], iteration_bounds = array<i64: 2, 1>, scalar_prefetch = 0 : i64, scratch_operands = 0 : i64, tpu.core_type = #tpu.core_type<tc>, window_params = [{transform_indices = @transform_0, window_bounds = array<i64: 8, 512>}, {transform_indices = @transform_1, window_bounds = array<i64: 1, 512>}, {transform_indices = @transform_2, window_bounds = array<i64: 1, 512>}, {transform_indices = @transform_3, window_bounds = array<i64: 8, 512>}]} {
    %c0 = arith.constant 0 : index
    %c0_0 = arith.constant 0 : index
    %0 = vector.load %arg2[%c0, %c0_0] : memref<8x512xf32, #tpu.memory_space<vmem>>, vector<8x512xf32>
    %c0_1 = arith.constant 0 : index
    %c0_2 = arith.constant 0 : index
    %1 = vector.load %arg3[%c0_1, %c0_2] : memref<1x512xf32, #tpu.memory_space<vmem>>, vector<1x512xf32>
    %2 = vector.broadcast %1 : vector<1x512xf32> to vector<8x512xf32>
    %3 = arith.subf %0, %2 : vector<8x512xf32>
    %c0_3 = arith.constant 0 : index
    %c0_4 = arith.constant 0 : index
    %4 = vector.load %arg4[%c0_3, %c0_4] : memref<1x512xf32, #tpu.memory_space<vmem>>, vector<1x512xf32>
    %5 = vector.broadcast %4 : vector<1x512xf32> to vector<8x512xf32>
    %6 = arith.mulf %3, %5 : vector<8x512xf32>
    %c0_5 = arith.constant 0 : index
    %c0_6 = arith.constant 0 : index
    %7 = vector.load %arg5[%c0_5, %c0_6] : memref<8x512xf32, #tpu.memory_space<vmem>>, vector<8x512xf32>
    tpu.vector_store %arg5[%c0_5, %c0_6], %6 {strides = array<i32>} : memref<8x512xf32, #tpu.memory_space<vmem>>, vector<8x512xf32>,
    return
  }
  func.func @transform_0(%arg0: i32, %arg1: i32) -> (i32, i32) {
    %c0_i32 = arith.constant 0 : i32
    return %arg1, %arg0 : i32, i32
  }
  func.func @transform_1(%arg0: i32, %arg1: i32) -> (i32, i32) {
    %c0_i32 = arith.constant 0 : i32
    %c0_i32_0 = arith.constant 0 : i32
    return %c0_i32, %arg0 : i32, i32
  }
  func.func @transform_2(%arg0: i32, %arg1: i32) -> (i32, i32) {
    %c0_i32 = arith.constant 0 : i32
    %c0_i32_0 = arith.constant 0 : i32
    return %c0_i32, %arg0 : i32, i32
  }
  func.func @transform_3(%arg0: i32, %arg1: i32) -> (i32, i32) {
    %c0_i32 = arith.constant 0 : i32
    return %arg1, %arg0 : i32, i32
  }
}

</mosaic_0001>

<bundles_post_ra>
// kernel: tpu_custom_call.1
= control target key start
LH: loop header
LB: loop body
LE: loop exit
PB: predicated region body
PF: predicated region fallthrough
CT: control target
= control target key end

     0   :  { %8 = vsyncpa [#allocation3], 0  ;;  %s1108_s0 = inlined_call_operand.hbm [shape: f32[2,1024], index: 0, kind: input, shape index: {}]   ;;  %s1109_s1 = inlined_call_operand.hbm [shape: f32[1,1024], index: 1, kind: input, shape index: {}]   ;;  %s1110_s2 = inlined_call_operand.hbm [shape: f32[1,1024], index: 2, kind: input, shape index: {}]   ;;  %s1111_s3 = inlined_call_operand.hbm [shape: f32[2,1024], index: 3, kind: output, shape index: {}]  }
   0x1   :  { %10 = vsyncpa [#allocation3 + $0x1], 0 }
   0x2   :  { %11 = vsyncpa [#allocation6], 0 }
   0x3   :  { %13 = vsyncpa [#allocation6 + $0x1], 0 }
   0x4   :  { %14 = vsyncpa [#allocation4], 0 }
   0x5   :  { %16 = vsyncpa [#allocation4 + $0x1], 0  ;;  %s870_s12 = smov 0   ;;  %s872_s13 = smov 0  }
   0x6   :  { %s874_s14 = smov 0   ;;  %s876_s15 = smov 0  }
   0x7   :  { %s878_s16 = smov 0   ;;  %s880_s17 = smov 0  }
   0x8 LB: > { %s901_s18 = sadd.s32 4294967295, %s837_s17   ;;  %s583_s19 = sadd.s32 4294967294, %s837_s17   ;;  %s837_s17 = sphi %s880_s17, %s22_s17   ;;  %s833_s16 = sphi %s878_s16, %s1126_s16   ;;  %s829_s15 = sphi %s876_s15, %s1125_s15   ;;  %s825_s14 = sphi %s874_s14, %s1124_s14   ;;  %s821_s13 = sphi %s872_s13, %s1123_s13   ;;  %s817_s12 = sphi %s870_s12, %s1122_s12  }
   0x9   : > { %s34_s20 = sadd.s32 1, %s833_s16  ;;  %s43_s21 = sadd.s32 1, %s825_s14 }
   0xa   : > { %p36_p0 = scmp.ge.s32.totalorder %s34_s20, 2  ;;  %p50_p1 = scmp.ne.s32.totalorder %s825_s14, %s821_s13 }
   0xb   : > { %p51_p2 = scmp.eq.s32.totalorder %s837_s17, 0  ;;  %p56_p3 = scmp.ne.s32.totalorder %s821_s13, %s817_s12 }
   0xc   : > { %s1128_s20 = smov (%p36_p0, %s34_s20), 0  ;;  %p57_p5 = scmp.eq.s32.totalorder %s901_s18, 0 }
   0xd   : > { %p913_p4 = por %p51_p2, %p50_p1  ;;  %s39_s23 = ssub.s32 %s833_s16, %s1128_s20 }
   0xe   : > { %p134_p6 = scmp.eq.s32.totalorder %s901_s18, 1  ;;  %p41_p7 = scmp.eq.s32.totalorder %s39_s23, 0 }
   0xf   : > { %p921_p8 = por %p57_p5, %p56_p3  ;;  %p140_p10 = scmp.eq.s32.totalorder %s583_s19, 1 }
  0x10   : > { %p925_p9 = por %p134_p6, %p50_p1  ;;  %p1112_p12 = scmp.ge.s32.totalorder %s837_s17, 2 }
  0x11   : > { %s1115_s24 = scalar_select %p921_p8, 1, 0 }
  0x12   : > { %s1116_s25 = scalar_select %p925_p9, 1, 0 }
  0x13   : > { %s930_s26 = scalar_select %p41_p7, %s825_s14, %s43_s21  }
  0x14   : > { %p932_p11 = por %p140_p10, %p56_p3  ;;  %156 = sbr.rel (%p1112_p12) target bundleno = 108 (0x6c), region = 16 }
  0x16   : > { %s1117_s27 = scalar_select %p932_p11, 1, 0 }
  0x1b   : > { %159 = sbr.rel (!%p913_p4) target bundleno = 59 (0x3b), region = 20  ;;  %s160_s28 = sand.u32 (%p913_p4), 1, %s825_s14  }
  0x1c   : > { %s586_s29 = sshll.u32 (%p913_p4), %s160_s28, 5  ;;  %s942_s30 = scalar_lea.sflag (%p913_p4), [#allocation3], %s160_s28 }
  0x1d   : > { %s164_s4 = scalar_lea.vmem (%p913_p4), [#allocation2], %s586_s29 }
  0x22   : > { %172 = vsyncadd %s942_s30, 384  ;;  %s605_s5 = sshll.u32 %s833_s16, 7  ;;  %s179_s6 = sshll.u32 %s164_s4, 4  ;;  %s951_s6 = int_to_ptr.vmem [resolvable:$true] %s179_s6 }
  0x23   : > { %s949_s9 = scalar_lea.hbm %s1108_s0, %s605_s5  ;;  %s677_s21 = scalar_lea.hbm %s1108_s0, 256 }
  0x24   : > { %s675_s10 = scalar_lea.hbm %s949_s9, 128  ;;  %p678_p0 = scmp.lt.u32.totalorder %s949_s9, %s1108_s0 }
  0x25   : > { %p676_p13 = scmp.ne.s32.totalorder %s949_s9, %s675_s10  ;;  %p679_p1 = scmp.lt.u32.totalorder %s677_s21, %s675_s10 }
  0x26   : > { %p681_p3 = scmp.lt.u32.totalorder %s675_s10, %s949_s9 }
  0x27   : > { %p680_p2 = por %p679_p1, %p678_p0 }
  0x29   : > { %p682_p5 = por %p681_p3, %p680_p2 }
  0x2b   : > { %p683_p6 = pnand %p682_p5, %p676_p13 }
  0x2d   : > { %686 = shalt.err (!%p683_p6)
}
  0x2e   : > { %s687_s29 = scalar_lea.vmem %s951_s6, 128  ;;  %s839_s4 = smov [#allocation2]  }
  0x2f   : > { %p688_p7 = scmp.ne.s32.totalorder %s951_s6, %s687_s29  ;;  %s689_s5 = sshll.u32 %s839_s4, 4  ;;  %s690_s5 = int_to_ptr.vmem [resolvable:$false] %s689_s5 }
  0x30   : > { %s691_s7 = scalar_lea.vmem %s690_s5, 1024  ;;  %p692_p10 = scmp.lt.s32.totalorder %s951_s6, %s690_s5 }
  0x31   : > { %p693_p12 = scmp.lt.s32.totalorder %s691_s7, %s687_s29 }
  0x33   : > { %p694_p11 = por %p693_p12, %p692_p10 }
  0x35   : > { %p695_p9 = pnand %p694_p11, %p688_p7 }
  0x37   : > { %698 = shalt.err (!%p695_p9)
}
  0x38   : > { %s840_s8 = smov 256   ;;  %s841_s10 = smov 128  }
  0x39   : > { %s842_s11 = smov 8  }
  0x3a   : > { %185 = dma.hbm_to_vmem [thread:$0]  %s949_s9, 128, %s951_s6, %s942_s30, %s840_s8, %s841_s10, %s842_s11  }
  0x3b PF: > { %s189_s19 = sand.u32 1, %s837_s17   ;;  %s191_s21 = sand.u32 1, %s825_s14  }
  0x3c   : > { %s971_s23 = sshll.u32 %s191_s21, 2  ;;  %s606_s28 = sshll.u32 %s833_s16, 6 }
  0x3d   : > { %s979_s5 = scalar_lea.hbm %s1109_s1, %s606_s28  ;;  %s193_s30 = scalar_lea.vmem [#allocation5], %s971_s23 }
  0x3e   : > { %s201_s6 = sshll.u32 %s193_s30, 4  ;;  %s982_s9 = scalar_lea.sflag [#allocation6], %s189_s19  ;;  %s202_s6 = int_to_ptr.vmem [resolvable:$true] %s201_s6 }
  0x3f   : > { %s699_s7 = scalar_lea.hbm %s979_s5, 64  ;;  %s703_s11 = scalar_lea.hbm %s1109_s1, 128 }
  0x40   : > { %p700_p9 = scmp.ne.s32.totalorder %s979_s5, %s699_s7  ;;  %p704_p13 = scmp.lt.u32.totalorder %s979_s5, %s1109_s1 }
  0x41   : > { %p705_p0 = scmp.lt.u32.totalorder %s703_s11, %s699_s7  ;;  %p707_p2 = scmp.lt.u32.totalorder %s699_s7, %s979_s5 }
  0x42   : > { %p701_p11 = pnand %p700_p9, %p913_p4 }
  0x43   : > { %p706_p1 = por %p705_p0, %p704_p13 }
  0x44   : > { %p702_p12 = pneg %p701_p11 }
  0x45   : > { %p708_p3 = por %p707_p2, %p706_p1 }
  0x47   : > { %p709_p5 = pnand %p708_p3, %p702_p12 }
  0x49   : > { %712 = shalt.err (!%p709_p5)
}
  0x4a   : > { %s713_s19 = scalar_lea.vmem %s202_s6, 64  ;;  %s843_s4 = smov [#allocation5]  }
  0x4b   : > { %p714_p6 = scmp.ne.s32.totalorder %s202_s6, %s713_s19  ;;  %s717_s30 = sshll.u32 %s843_s4, 4  ;;  %s718_s30 = int_to_ptr.vmem [resolvable:$false] %s717_s30 }
  0x4c   : > { %s719_s8 = scalar_lea.vmem %s718_s30, 128  ;;  %p720_p9 = scmp.lt.s32.totalorder %s202_s6, %s718_s30 }
  0x4d   : > { %p715_p7 = pnand %p714_p6, %p913_p4  ;;  %p721_p11 = scmp.lt.s32.totalorder %s719_s8, %s713_s19 }
  0x4f   : > { %p716_p10 = pneg %p715_p7  ;;  %p722_p8 = por %p721_p11, %p720_p9 }
  0x51   : > { %p723_p0 = pnand %p722_p8, %p716_p10 }
  0x53   : > { %726 = shalt.err (!%p723_p0)
}
  0x54   : > { %609 = dma.hbm_to_vmem [thread:$0]  (%p913_p4), %s979_s5, 64, %s202_s6, %s982_s9  }
  0x55   : > { %s1007_s11 = scalar_lea.hbm %s1110_s2, %s606_s28  ;;  %s212_s21 = scalar_lea.vmem [#allocation7], %s971_s23 }
  0x56   : > { %s220_s29 = sshll.u32 %s212_s21, 4  ;;  %s727_s19 = scalar_lea.hbm %s1007_s11, 64  ;;  %s221_s29 = int_to_ptr.vmem [resolvable:$true] %s220_s29 }
  0x57   : > { %p728_p8 = scmp.ne.s32.totalorder %s1007_s11, %s727_s19  ;;  %s731_s6 = scalar_lea.hbm %s1110_s2, 128 }
  0x58   : > { %p732_p1 = scmp.lt.u32.totalorder %s1007_s11, %s1110_s2  ;;  %p733_p2 = scmp.lt.u32.totalorder %s731_s6, %s727_s19 }
  0x59   : > { %p729_p12 = pnand %p728_p8, %p913_p4  ;;  %p735_p5 = scmp.lt.u32.totalorder %s727_s19, %s1007_s11 }
  0x5a   : > { %p734_p3 = por %p733_p2, %p732_p1 }
  0x5b   : > { %p730_p13 = pneg %p729_p12 }
  0x5c   : > { %p736_p6 = por %p735_p5, %p734_p3 }
  0x5e   : > { %p737_p7 = pnand %p736_p6, %p730_p13 }
  0x60   : > { %740 = shalt.err (!%p737_p7)
}
  0x61   : > { %s741_s23 = scalar_lea.vmem %s221_s29, 64  ;;  %s844_s28 = smov [#allocation7]  }
  0x62   : > { %p742_p10 = scmp.ne.s32.totalorder %s221_s29, %s741_s23  ;;  %s745_s7 = sshll.u32 %s844_s28, 4  ;;  %s746_s7 = int_to_ptr.vmem [resolvable:$false] %s745_s7 }
  0x63   : > { %s747_s10 = scalar_lea.vmem %s746_s7, 128  ;;  %p748_p0 = scmp.lt.s32.totalorder %s221_s29, %s746_s7 }
  0x64   : > { %p743_p9 = pnand %p742_p10, %p913_p4  ;;  %p749_p8 = scmp.lt.s32.totalorder %s747_s10, %s741_s23 }
  0x66   : > { %p744_p11 = pneg %p743_p9  ;;  %p750_p12 = por %p749_p8, %p748_p0 }
  0x68   : > { %p751_p1 = pnand %p750_p12, %p744_p11 }
  0x6a   : > { %754 = shalt.err (!%p751_p1)
}
  0x6b   : > { %610 = dma.hbm_to_vmem [thread:$0]  (%p913_p4), %s1007_s11, 64, %s221_s29, %s982_s9  }
  0x6c PF: > { %p595_p13 = scmp.ge.s32.totalorder %s837_s17, 1  ;;  %p225_p2 = scmp.lt.s32.totalorder %s837_s17, 3 }
  0x6e   : > { %p226_p3 = pnand %p595_p13, %p225_p2 }
  0x6f   : > { %s1031_s21 = sand.u32 (!%p226_p3), 1, %s821_s13   ;;  %p1118_p4 = scmp.ne.s32.totalorder (!%p226_p3), %s1115_s24, 0 }
  0x70   : > { %229 = sbr.rel (%p226_p3) target bundleno = 169 (0xa9), region = 32  ;;  %s596_s19 = sshll.u32 (!%p226_p3), %s1031_s21, 5 }
  0x71   : > { %s232_s4 = scalar_lea.sflag (!%p226_p3), [#allocation3], %s1031_s21  ;;  %s1037_s22 = scalar_lea.vmem (!%p226_p3), [#allocation2], %s596_s19 }
  0x77   : > { %804 = dma.done.wait (%p1118_p4), %s232_s4, 512  }
  0x78   : > { %806 = vsyncadd (%p1118_p4), %s232_s4, 4294966784  ;;  %s240_s9 = sand.u32 1, %s901_s18   ;;  %s597_s11 = sshll.u32 %s1031_s21, 2 }
  0x79   : > { %s241_s29 = scalar_lea.sflag [#allocation6], %s240_s9  ;;  %s244_s5 = scalar_lea.vmem [#allocation5], %s597_s11 }
  0x7a   : > { %808 = dma.done.wait (%p1118_p4), %s241_s29, 128  }
  0x7b   : > { %810 = vsyncadd (%p1118_p4), %s241_s29, 4294967168  ;;  %v304_v0 = vlaneseq  ;;  %v845_v1 = vmov 1983009808   ;;  %v302_v9 = vld [vmem:[%s244_s5] sm:$0xf]  ;;  %s253_s18 = scalar_lea.vmem [#allocation7], %s597_s11 }
  0x7c   : > { %v325_v2 = vunpack.c.l.s4 %v845_v1  ;;  %v364_v11 = vld [vmem:[%s253_s18] sm:$0xf]  ;;  %v298_v28 = vld [vmem:[%s1037_s22] sm:$0xff]  ;;  %v300_v36 = vld [vmem:[%s1037_s22 + $0x10] sm:$0xff]  ;;  %s285_s24 = scalar_lea.vmem [#allocation8], %s596_s19  ;;  %s431_s6 = scalar_lea.sflag [#allocation4], %s1031_s21 }
  0x7d   : > { %v305_v3 = vshrl.u32 %v304_v0, 7  ;;  %v299_v35 = vld [vmem:[%s1037_s22 + $0x8] sm:$0xff]  ;;  %v301_v39 = vld [vmem:[%s1037_s22 + $0x18] sm:$0xff]  ;;  %p1119_p5 = scmp.ne.s32.totalorder %s1116_s25, 0 }
  0x7e   : > { %v326_v4 = vunpack.c.0.s8 %v325_v2 }
  0x7f   : > { %v306_v5 = vsub.s32 0, %v305_v3  ;;  %v310_v6 = vsub.s32 1, %v305_v3  ;;  %v314_v7 = vsub.s32 2, %v305_v3  ;;  %v318_v8 = vsub.s32 3, %v305_v3 }
  0x80   : > { %v329_v10 = vsub.s32 %v326_v4, %v305_v3 }
  0x81   : > { %v307_v12 = vrot.slane %v302_v9, %v306_v5  ;;  %v311_v13 = vrot.slane %v302_v9, %v310_v6  ;;  %v315_v14 = vrot.slane %v302_v9, %v314_v7  ;;  %v319_v15 = vrot.slane %v302_v9, %v318_v8 }
  0x82   : > { %v369_v16 = vrot.slane %v364_v11, %v306_v5  ;;  %v373_v17 = vrot.slane %v364_v11, %v310_v6  ;;  %v377_v18 = vrot.slane %v364_v11, %v314_v7  ;;  %v381_v19 = vrot.slane %v364_v11, %v318_v8 }
  0x83   : > { %v320_v20 = vcombine.low %v307_v12, %v311_v13  ;;  %v322_v21 = vcombine.low %v315_v14, %v319_v15  ;;  %v321_v22 = vcombine.high %v307_v12, %v311_v13  ;;  %v323_v23 = vcombine.high %v315_v14, %v319_v15 }
  0x84   : > { %v382_v24 = vcombine.low %v369_v16, %v373_v17  ;;  %v384_v25 = vcombine.low %v377_v18, %v381_v19  ;;  %v383_v26 = vcombine.high %v369_v16, %v373_v17  ;;  %v385_v27 = vcombine.high %v377_v18, %v381_v19 }
  0x85   : > { %v330_v29 = vrot.slane %v320_v20, %v329_v10  ;;  %v344_v30 = vrot.slane %v322_v21, %v329_v10  ;;  %v337_v31 = vrot.slane %v321_v22, %v329_v10  ;;  %v351_v32 = vrot.slane %v323_v23, %v329_v10 }
  0x86   : > { %v392_v33 = vrot.slane %v382_v24, %v329_v10  ;;  %v406_v34 = vrot.slane %v384_v25, %v329_v10  ;;  %v399_v37 = vrot.slane %v383_v26, %v329_v10  ;;  %v413_v38 = vrot.slane %v385_v27, %v329_v10 }
  0x87   : > { %v352_v40 = vcombine.low %v330_v29, %v344_v30  ;;  %v353_v41 = vcombine.high %v330_v29, %v344_v30  ;;  %v354_v42 = vcombine.low %v337_v31, %v351_v32  ;;  %v355_v43 = vcombine.high %v337_v31, %v351_v32 }
  0x88   : > { %v414_v44 = vcombine.low %v392_v33, %v406_v34  ;;  %v415_v45 = vcombine.high %v392_v33, %v406_v34  ;;  %v416_v46 = vcombine.low %v399_v37, %v413_v38  ;;  %v417_v47 = vcombine.high %v399_v37, %v413_v38  ;;  %437 = sbr.rel (!%p1119_p5) target bundleno = 169 (0xa9), region = 48 }
  0x89   : > { %v360_v48 = vsub.f32 %v298_v28, %v352_v40  ;;  %v361_v49 = vsub.f32 %v299_v35, %v353_v41  ;;  %v362_v50 = vsub.f32 %v300_v36, %v354_v42  ;;  %v363_v51 = vsub.f32 %v301_v39, %v355_v43 }
  0x8b   : > { %v422_v52 = vmul.f32 %v414_v44, %v360_v48  ;;  %v423_v53 = vmul.f32 %v415_v45, %v361_v49  ;;  %v424_v54 = vmul.f32 %v416_v46, %v362_v50  ;;  %v425_v55 = vmul.f32 %v417_v47, %v363_v51 }
  0x8d   : > { %426 = vst [vmem:[%s285_s24] sm:$0xff] %v422_v52  ;;  %427 = vst [vmem:[%s285_s24 + $0x8] sm:$0xff] %v423_v53 }
  0x8e   : > { %428 = vst [vmem:[%s285_s24 + $0x10] sm:$0xff] %v424_v54  ;;  %429 = vst [vmem:[%s285_s24 + $0x18] sm:$0xff] %v425_v55 }
  0x8f   : > { %445 = vsyncadd %s431_s6, 384  ;;  %s608_s30 = sshll.u32 %s829_s15, 7  ;;  %s452_s8 = sshll.u32 %s285_s24, 4  ;;  %s1066_s8 = int_to_ptr.vmem [resolvable:$true] %s452_s8 }
  0x90   : > { %s1064_s7 = scalar_lea.hbm %s1111_s3, %s608_s30  ;;  %s755_s10 = scalar_lea.vmem %s1066_s8, 128 }
  0x91   : > { %p756_p6 = scmp.ne.s32.totalorder %s1066_s8, %s755_s10  ;;  %s846_s25 = smov [#allocation8]  }
  0x92   : > { %s757_s19 = sshll.u32 %s846_s25, 4  ;;  %s758_s19 = int_to_ptr.vmem [resolvable:$false] %s757_s19 }
  0x93   : > { %s759_s4 = scalar_lea.vmem %s758_s19, 1024  ;;  %p760_p7 = scmp.lt.s32.totalorder %s1066_s8, %s758_s19 }
  0x94   : > { %p761_p10 = scmp.lt.s32.totalorder %s759_s4, %s755_s10 }
  0x96   : > { %p762_p9 = por %p761_p10, %p760_p7 }
  0x98   : > { %p763_p11 = pnand %p762_p9, %p756_p6 }
  0x9a   : > { %766 = shalt.err (!%p763_p11)
}
  0x9b   : > { %s767_s15 = scalar_lea.hbm %s1064_s7, 128  ;;  %s769_s11 = scalar_lea.hbm %s1111_s3, 256 }
  0x9c   : > { %p768_p0 = scmp.ne.s32.totalorder %s1064_s7, %s767_s15  ;;  %p770_p8 = scmp.lt.u32.totalorder %s1064_s7, %s1111_s3 }
  0x9d   : > { %p771_p12 = scmp.lt.u32.totalorder %s769_s11, %s767_s15  ;;  %p773_p13 = scmp.lt.u32.totalorder %s767_s15, %s1064_s7 }
  0x9f   : > { %p772_p1 = por %p771_p12, %p770_p8 }
  0xa1   : > { %p774_p2 = por %p773_p13, %p772_p1 }
  0xa3   : > { %p775_p3 = pnand %p774_p2, %p768_p0 }
  0xa5   : > { %778 = shalt.err (!%p775_p3)
}
  0xa6   : > { %s847_s18 = smov 128   ;;  %s848_s24 = smov 256  }
  0xa7   : > { %s849_s30 = smov 8  }
  0xa8   : > { %458 = dma.vmem_to_hbm [thread:$0]  %s1066_s8, 128, %s1064_s7, %s431_s6, %s847_s18, %s848_s24, %s849_s30  }
  0xa9 PF: > { %s467_s23 = sand.u32 1, %s817_s12   ;;  %p1120_p4 = scmp.ne.s32.totalorder %s1117_s27, 0 }
  0xaa   : > { %p1121_p5 = scmp.ge.s32.totalorder %s837_s17, 2  ;;  %s468_s28 = scalar_lea.sflag [#allocation4], %s467_s23 }
  0xac   : > { %p616_p6 = pnand %p1121_p5, %p1120_p4 }
  0xae   : > { %812 = dma.done.wait (!%p616_p6), %s468_s28, 512  }
  0xaf   : > { %814 = vsyncadd (!%p616_p6), %s468_s28, 4294966784  ;;  %s22_s17 = sadd.s32 1, %s837_s17   ;;  %s1122_s12 = smov %s821_s13 }
  0xb0   : > { %p19_p7 = scmp.ge.s32.totalorder %s22_s17, 4   ;;  %s1123_s13 = smov %s825_s14 }
  0xb1   : > { %s1124_s14 = smov %s930_s26  ;;  %s1125_s15 = smov %s833_s16 }
  0xb2   : > { %s1126_s16 = smov %s1128_s20  ;;  %21 = sbr.rel (!%p19_p7) target bundleno = 8 (0x8), region = 101 }
  0xb9   :  { %473 = vsyncpa [#allocation3], 1 }
  0xba   :  { %475 = vsyncpa [#allocation3 + $0x1], 1 }
  0xbb   :  { %476 = vsyncpa [#allocation6], 1 }
  0xbc   :  { %478 = vsyncpa [#allocation6 + $0x1], 1 }
  0xbd   :  { %479 = vsyncpa [#allocation4], 1 }
  0xbe   :  { %481 = vsyncpa [#allocation4 + $0x1], 1 }

</bundles_post_ra>
